<compile_context>
chip_gen: v6e
topology: v6e:2x2x1
jax: 0.10.0
libtpu: 0.0.40
codegen_flags: <defaults>
</compile_context>

<pallas_src>
import numpy as np
import jax
import jax.numpy as jnp
from jax.experimental import pallas as pl
from jax.experimental.pallas import tpu as pltpu


def _pick_tile(m, cap_lanes=8192):
    """Largest multiple-of-128 divisor of m, capped at `cap_lanes`.

    `m` is always a multiple of 128 (the wrapper pads).  The cap is not a
    VMEM/vreg limit — the collapsed kernel has no long-lived unrolled
    intermediates — it just keeps per-step bytes large enough (~0.8 MB) to
    hide the per-grid-step overhead while VMEM stays ~3 MB double-buffered.
    """
    q = m // 128
    best = 1
    for k in range(1, min(q, cap_lanes // 128) + 1):
        if q % k == 0:
            best = k
    return 128 * best


def _affine_kernel(x_ref, w_ref, b_ref, o_ref):
    """out_tile = W_fold @ x_tile + b_fold   (the whole collapsed DAG).

    x_ref : (r_in,  tile_m)  io_dtype, lane-dense on the folded spatial dim
    w_ref : (r_out, r_in)    f32, VMEM-resident (constant index_map)
    b_ref : (r_out, 1)       f32, VMEM-resident
    o_ref : (r_out, tile_m)  io_dtype

    The tiny matmul rides the otherwise-idle MXU (the kernel is HBM-bound);
    accumulation is f32 regardless of the I/O dtype (v5e has no bf16 VPU).
    """
    x = x_ref[...].astype(jnp.float32)
    y = jnp.dot(w_ref[...], x, preferred_element_type=jnp.float32) + b_ref[...]
    o_ref[...] = y.astype(o_ref.dtype)


class Graph:
    """JAX/Pallas port of the (stubbed) PyTorch Graph module."""

    def __init__(self, adj_matrix, ops, search_space, channel_in, channel_out,
                 key=jax.random.PRNGKey(0), io_dtype=jnp.float32):
        self.adj = np.triu(np.asarray(adj_matrix, dtype=np.float32), 1)
        self.num_nodes = int(self.adj.shape[0])
        self.in_dim = int(channel_in)
        self.out_dim = int(channel_out)
        self.search_space = search_space
        self.ops = ops                      # TODO(synk): ops unused (stub op)
        self.io_dtype = io_dtype
        self._key = key
        # Defaults from the reference module; also builds params + kernel.
        self.configure_input_output_index(0, 7)

    # --- module API ---------------------------------------------------------

    def create_nodes_from_ops(self, ops):
        # TODO(synk): reference body is `pass`; op selection not implemented.
        pass

    def aggregate(self, x):
        # TODO(synk): reference body is `pass`; aggregation (sum over
        # predecessors) is folded into the offline affine collapse.
        pass

    def configure_input_output_index(self, input, output):
        if input == output:
            raise ValueError("input_index must differ from output_index")
        self.input_index = int(input)
        self.output_index = int(output)
        self._build_params()
        self._build_forward()

    def forward(self, inputs):
        n, c, h, w = inputs.shape
        assert c == self.in_dim
        y = self._fwd(jnp.asarray(inputs), self._w_fold, self._b_fold)
        return y  # NCHW, (n, out_dim, h, w), dtype == self.io_dtype

    __call__ = forward

    # --- internals ----------------------------------------------------------

    def _build_params(self):
        K, c_in, c_out = self.num_nodes, self.in_dim, self.out_dim
        # Small init scale keeps the linear DAG's effective gain ~O(1), so the
        # bf16-I/O path stays numerically meaningful.
        scale = 0.5 / float(c_in)
        wmid = np.zeros((K, c_in, c_in), np.float32)   # per-node (c_in, c_in)
        bmid = np.zeros((K, c_in, 1), np.float32)
        wout = np.zeros((c_out, c_in), np.float32)
        bout = np.zeros((c_out, 1), np.float32)
        for i in range(K):
            if i == self.input_index:
                continue
            nk = jax.random.fold_in(self._key, i)
            wk, bk = jax.random.split(nk)
            co = c_out if i == self.output_index else c_in
            w = np.asarray(jax.random.normal(wk, (co, c_in), jnp.float32)) * scale
            b = np.asarray(0.01 * jax.random.normal(bk, (co, 1), jnp.float32))
            if i == self.output_index:
                wout, bout = w, b
            else:
                wmid[i], bmid[i] = w, b
        self.wmid = jnp.asarray(wmid)
        self.bmid = jnp.asarray(bmid)
        self.wout = jnp.asarray(wout)
        self.bout = jnp.asarray(bout)

    def _build_forward(self):
        K, c_in, c_out = self.num_nodes, self.in_dim, self.out_dim
        adj = self.adj

        # ---- offline DAG collapse: compose per-node affine maps ------------
        # Mirrors the general-DAG reference semantics exactly (sum-aggregate,
        # predecessors filtered to already-computed nodes).
        wmid = np.asarray(self.wmid, np.float64)
        bmid = np.asarray(self.bmid, np.float64)[..., 0]
        wout = np.asarray(self.wout, np.float64)
        bout = np.asarray(self.bout, np.float64)[..., 0]
        A = {self.input_index: np.eye(c_in, dtype=np.float64)}
        c = {self.input_index: np.zeros((c_in,), dtype=np.float64)}
        w_eff = np.zeros((c_out, c_in), np.float64)
        b_eff = np.zeros((c_out,), np.float64)
        for i in range(K):
            if i == self.input_index:
                continue
            plist = [j for j in range(K) if adj[j, i] != 0.0 and j in A]
            aggA = sum((A[p] for p in plist), np.zeros((c_in, c_in)))
            aggc = sum((c[p] for p in plist), np.zeros((c_in,)))
            if i == self.output_index:
                w_eff = wout @ aggA
                b_eff = wout @ aggc + bout
            else:
                A[i] = wmid[i] @ aggA
                c[i] = wmid[i] @ aggc + bmid[i]

        # ---- sublane folding: fill all 8 f32 sublanes -----------------------
        f = 8 // c_in if (c_in < 8 and 8 % c_in == 0) else 1
        r_in, r_out = c_in * f, c_out * f
        w_fold = np.kron(w_eff, np.eye(f)).astype(np.float32)        # (r_out, r_in)
        b_fold = np.repeat(b_eff, f).reshape(r_out, 1).astype(np.float32)
        self._fold = f
        self._w_fold = jnp.asarray(w_fold)
        self._b_fold = jnp.asarray(b_fold)

        io_dtype = self.io_dtype
        out_dim = self.out_dim
        io_isize = int(np.dtype(io_dtype).itemsize)

        def fwd(x4d, w_f, b_f):
            n, cc, h, w = x4d.shape
            hw = h * w
            m_unit = f * 128
            hw_pad = ((hw + m_unit - 1) // m_unit) * m_unit
            x = x4d.reshape(n, cc, hw).astype(io_dtype)     # NCHW -> (N, C, HW)
            if hw_pad != hw:
                x = jnp.pad(x, ((0, 0), (0, 0), (0, hw_pad - hw)))
            M = hw_pad // f
            xf = x.reshape(n, r_in, M)                      # free row-major fold
            tile_m = _pick_tile(M)
            grid = (n, M // tile_m)

            flops = 2 * n * M * r_out * r_in + n * M * r_out
            bytes_acc = (n * M * (r_in + r_out)) * io_isize \
                        + (r_out * r_in + r_out) * 4

            yf = pl.pallas_call(
                _affine_kernel,
                out_shape=jax.ShapeDtypeStruct((n, r_out, M), io_dtype),
                grid_spec=pltpu.PrefetchScalarGridSpec(
                    num_scalar_prefetch=0,
                    grid=grid,
                    in_specs=[
                        # input tile: (r_in, tile_m), lane-dense on folded M
                        pl.BlockSpec((None, r_in, tile_m),
                                     lambda b, m: (b, 0, m)),
                        # folded weight / bias: resident (constant block index)
                        pl.BlockSpec((r_out, r_in), lambda b, m: (0, 0)),
                        pl.BlockSpec((r_out, 1), lambda b, m: (0, 0)),
                    ],
                    out_specs=pl.BlockSpec((None, r_out, tile_m),
                                           lambda b, m: (b, 0, m)),
                ),
                compiler_params=pltpu.CompilerParams(
                    dimension_semantics=("parallel", "parallel"),
                ),
                cost_estimate=pl.CostEstimate(
                    flops=int(flops), transcendentals=0,
                    bytes_accessed=int(bytes_acc)),
            )(xf, w_f, b_f)

            y = yf.reshape(n, out_dim, hw_pad)[:, :, :hw]   # free unfold + slice
            return y.reshape(n, out_dim, h, w)

        self._fwd = jax.jit(fwd)


def _reference_forward(graph, x_nchw):
    """Pure-JAX reference of the ORIGINAL (un-collapsed) DAG semantics."""
    n, c, h, w = x_nchw.shape
    x = x_nchw.astype(jnp.float32).reshape(n, c, h * w)
    K = graph.num_nodes
    feats = {graph.input_index: x}
    out = None
    for i in range(K):
        if i == graph.input_index:
            continue
        plist = [j for j in range(K)
                 if graph.adj[j, i] != 0.0 and j in feats]
        if plist:
            agg = feats[plist[0]]
            for p in plist[1:]:
                agg = agg + feats[p]
        else:
            agg = jnp.zeros_like(x)
        if i == graph.output_index:
            w_, b_ = graph.wout, graph.bout
        else:
            w_, b_ = graph.wmid[i], graph.bmid[i]
        res = jnp.einsum("ok,nkm->nom", w_, agg) + b_[None]
        if i == graph.output_index:
            out = res
        else:
            feats[i] = res
    return out.reshape(n, graph.out_dim, h, w)


if __name__ == "__main__":
    key = jax.random.PRNGKey(0)

    # Small, fixed 8-node DAG (strict upper triangle is taken inside Graph).
    adj = np.array(
        [[0, 1, 1, 0, 0, 0, 0, 1],
         [0, 0, 1, 1, 0, 0, 0, 0],
         [0, 0, 0, 1, 1, 0, 0, 0],
         [0, 0, 0, 0, 1, 1, 0, 0],
         [0, 0, 0, 0, 0, 1, 1, 0],
         [0, 0, 0, 0, 0, 0, 1, 1],
         [0, 0, 0, 0, 0, 0, 0, 1],
         [0, 0, 0, 0, 0, 0, 0, 0]], dtype=np.float32)

    channel_in, channel_out = 4, 8
    graph = Graph(adj, ops=None, search_space=None,
                  channel_in=channel_in, channel_out=channel_out,
                  key=jax.random.PRNGKey(0))

    key, xk = jax.random.split(key)
    x = jax.random.normal(xk, (2, channel_in, 16, 16), jnp.float32)  # NCHW

    # f32 I/O path: must match the un-collapsed DAG reference tightly.
    y = graph(x)
    jax.block_until_ready(y)
    assert y.shape == (2, channel_out, 16, 16)
    y_ref = _reference_forward(graph, x)
    np.testing.assert_allclose(np.asarray(y), np.asarray(y_ref),
                               rtol=1e-5, atol=1e-5)

    # bf16 I/O path (feedback #5): halves HBM bytes at the kernel boundary.
    # Loose tolerance: differences are pure bf16 input/output quantization.
    graph_bf16 = Graph(adj, ops=None, search_space=None,
                       channel_in=channel_in, channel_out=channel_out,
                       key=jax.random.PRNGKey(0), io_dtype=jnp.bfloat16)
    y16 = graph_bf16(x)
    jax.block_until_ready(y16)
    assert y16.shape == (2, channel_out, 16, 16)
    assert y16.dtype == jnp.bfloat16
    np.testing.assert_allclose(np.asarray(y16, dtype=np.float32),
                               np.asarray(y_ref), rtol=5e-2, atol=1e-1)

    print("KERNEL_OK")
</pallas_src>

<mosaic_0001>
module attributes {stable_mosaic.version = 11 : i64} {
  func.func @_affine_kernel(%arg0: i32, %arg1: i32, %arg2: memref<1x8x128xf32, #tpu.memory_space<vmem>>, %arg3: memref<16x8xf32, #tpu.memory_space<vmem>>, %arg4: memref<16x1xf32, #tpu.memory_space<vmem>>, %arg5: memref<1x16x128xf32, #tpu.memory_space<vmem>>) attributes {dimension_semantics = [#tpu.dimension_semantics<parallel>, #tpu.dimension_semantics<parallel>], iteration_bounds = array<i64: 2, 1>, scalar_prefetch = 0 : i64, scratch_operands = 0 : i64, tpu.core_type = #tpu.core_type<tc>, window_params = [{transform_indices = @transform_0, window_bounds = array<i64: 1, 8, 128>}, {pipeline_mode = #tpu.pipeline_mode<synchronous>, transform_indices = @transform_1, window_bounds = array<i64: 16, 8>}, {pipeline_mode = #tpu.pipeline_mode<synchronous>, transform_indices = @transform_2, window_bounds = array<i64: 16, 1>}, {transform_indices = @transform_3, window_bounds = array<i64: 1, 16, 128>}]} {
    %c0 = arith.constant 0 : index
    %c0_0 = arith.constant 0 : index
    %c0_1 = arith.constant 0 : index
    %0 = vector.load %arg2[%c0, %c0_0, %c0_1] : memref<1x8x128xf32, #tpu.memory_space<vmem>>, vector<1x8x128xf32>
    %1 = vector.shape_cast %0 : vector<1x8x128xf32> to vector<8x128xf32>
    %c0_2 = arith.constant 0 : index
    %c0_3 = arith.constant 0 : index
    %2 = vector.load %arg3[%c0_2, %c0_3] : memref<16x8xf32, #tpu.memory_space<vmem>>, vector<16x8xf32>
    %cst = arith.constant dense<0.000000e+00> : vector<16x128xf32>
    %3 = tpu.matmul %2, %1, %cst {dimension_numbers = #tpu.dot_dimension_numbers<[1], [0], [0], [1], [0, 0, 1, 1], [], []>} : vector<16x8xf32>, vector<8x128xf32>, vector<16x128xf32> -> vector<16x128xf32>
    %c0_4 = arith.constant 0 : index
    %c0_5 = arith.constant 0 : index
    %4 = vector.load %arg4[%c0_4, %c0_5] : memref<16x1xf32, #tpu.memory_space<vmem>>, vector<16x1xf32>
    %5 = vector.broadcast %4 : vector<16x1xf32> to vector<16x128xf32>
    %6 = arith.addf %3, %5 : vector<16x128xf32>
    %c0_6 = arith.constant 0 : index
    %c0_7 = arith.constant 0 : index
    %c0_8 = arith.constant 0 : index
    %7 = vector.load %arg5[%c0_6, %c0_7, %c0_8] : memref<1x16x128xf32, #tpu.memory_space<vmem>>, vector<1x16x128xf32>
    %8 = vector.shape_cast %7 : vector<1x16x128xf32> to vector<16x128xf32>
    %9 = vector.shape_cast %6 : vector<16x128xf32> to vector<1x16x128xf32>
    tpu.vector_store %arg5[%c0_6, %c0_7, %c0_8], %9 {strides = array<i32>} : memref<1x16x128xf32, #tpu.memory_space<vmem>>, vector<1x16x128xf32>,
    return
  }
  func.func @transform_0(%arg0: i32, %arg1: i32) -> (i32, i32, i32) {
    %c0_i32 = arith.constant 0 : i32
    %c0_i32_0 = arith.constant 0 : i32
    return %arg0, %c0_i32, %arg1 : i32, i32, i32
  }
  func.func @transform_1(%arg0: i32, %arg1: i32) -> (i32, i32) {
    %c0_i32 = arith.constant 0 : i32
    %c0_i32_0 = arith.constant 0 : i32
    %c0_i32_1 = arith.constant 0 : i32
    return %c0_i32, %c0_i32_0 : i32, i32
  }
  func.func @transform_2(%arg0: i32, %arg1: i32) -> (i32, i32) {
    %c0_i32 = arith.constant 0 : i32
    %c0_i32_0 = arith.constant 0 : i32
    %c0_i32_1 = arith.constant 0 : i32
    return %c0_i32, %c0_i32_0 : i32, i32
  }
  func.func @transform_3(%arg0: i32, %arg1: i32) -> (i32, i32, i32) {
    %c0_i32 = arith.constant 0 : i32
    %c0_i32_0 = arith.constant 0 : i32
    return %arg0, %c0_i32, %arg1 : i32, i32, i32
  }
}

</mosaic_0001>

<bundles_post_ra>
// kernel: fwd.1
= control target key start
LH: loop header
LB: loop body
LE: loop exit
PB: predicated region body
PF: predicated region fallthrough
CT: control target
= control target key end

     0   :  { %s470_s12 = smov 0   ;;  %s472_s13 = smov 0   ;;  %s515_s0 = inlined_call_operand.vmem [shape: f32[2,8,128], index: 0, kind: input, shape index: {}]   ;;  %s516_s1 = inlined_call_operand.vmem [shape: f32[16,8], index: 1, kind: input, shape index: {}]   ;;  %s517_s2 = inlined_call_operand.vmem [shape: f32[16,1], index: 2, kind: input, shape index: {}]   ;;  %s518_s3 = inlined_call_operand.vmem [shape: f32[2,16,128], index: 3, kind: output, shape index: {}]  }
   0x1   :  { %s474_s14 = smov 0  }
   0x2 LB: > { %s25_s15 = sadd.s32 1, %s443_s13  ;;  %p382_p0 = scmp.ge.s32.totalorder %s447_s14, 1  ;;  %s447_s14 = sphi %s474_s14, %s13_s14   ;;  %s443_s13 = sphi %s472_s13, %s520_s13   ;;  %s439_s12 = sphi %s470_s12, %s519_s12  }
   0x3   : > { %p27_p1 = scmp.ge.s32.totalorder %s25_s15, 2  ;;  %p155_p2 = scmp.lt.s32.totalorder %s447_s14, 3 }
   0x5   : > { %s522_s15 = smov (%p27_p1, %s25_s15), 0  ;;  %p156_p3 = pnand %p382_p0, %p155_p2 }
   0x6   : > { %p184_p4 = scmp.lt.s32.totalorder (!%p156_p3), %s439_s12, 1 }
   0x7   : > { %159 = sbr.rel (%p156_p3) target bundleno = 216 (0xd8), region = 32 }
   0xc   : > { %v200_v0 = vld [vmem:[%s516_s1] sm:$0xff]  ;;  %vm214_vm0 = vcmask 64512   ;;  %v449_v2 = vmov 0   ;;  %s524_s12 = smov (!%p184_p4, %s439_s12), 1  ;;  %v203_v3 = vld [vmem:[%s517_s2 + $0x8] sm:$0xff] }
   0xd   : > { %v202_v1 = vld [vmem:[%s517_s2] sm:$0xff]  ;;  %396 = vmatprep.mubr.msk.f32.mxu0 %vm214_vm0, %v200_v0  ;;  %424 = vset.pattern.permute.xlu0 %v449_v2  ;;  %s383_s22 = sshll.u32 %s524_s12, 3  ;;  %v201_v5 = vld [vmem:[%s516_s1 + $0x8] sm:$0xff]  ;;  %s390_s28 = sshll.u32 %s524_s12, 4 }
   0xe   : > { %206 = vperm.xlu0 %424, %v202_v1   ;;  %s190_s25 = scalar_lea.vmem %s515_s0, %s383_s22  ;;  %s198_s4 = scalar_lea.vmem %s518_s3, %s390_s28 }
   0xf   : > { %v199_v4 = vld [vmem:[%s190_s25] sm:$0xff] }
  0x10   : > { %394 = vmatprep.subr.mxu0 %v199_v4 }
  0x11   : > { %395 = vmatpush3.msra.mxu0 %v199_v4 }
  0x12   : > { %211 = vperm.xlu0 %424, %v203_v3   ;;  %397 = vmatmul.mubr.msk.f32.vlgmr.msra.gmra.mxu0 %vm214_vm0, %v201_v5 }
  0x89   : > { %v207_v6 = vpop.permute.xlu0 %206 }
  0x8d   : > { %v212_v7 = vpop.permute.xlu0 %211 }
  0xd2   : > { %v398_v8 = vpop.f32.mrf.mxu0 }
  0xd3   : > { %v293_v9 = vadd.f32 %v398_v8, %v212_v7 }
  0xd4   : > { %v287_v10 = vpop.f32.mrf.mxu0 }
  0xd5   : > { %297 = vst [vmem:[%s198_s4 + $0x8] sm:$0xff] %v293_v9  ;;  %v288_v11 = vadd.f32 %v287_v10, %v207_v6 }
  0xd7   : > { %296 = vst [vmem:[%s198_s4] sm:$0xff] %v288_v11 }
  0xd8 PF: > { %s13_s14 = sadd.s32 1, %s447_s14   ;;  %s519_s12 = smov %s443_s13 }
  0xd9   : > { %p10_p5 = scmp.ge.s32.totalorder %s13_s14, 4   ;;  %s520_s13 = smov %s522_s15 }
  0xdb   :  { %12 = sbr.rel (!%p10_p5) target bundleno = 2 (0x2), region = 62 }

</bundles_post_ra>
